<compile_context>
chip_gen: v5e
topology: v5e:2x2
jax: 0.10.0
libtpu: 0.0.40
codegen_flags: <defaults>
</compile_context>

<pallas_src>
import functools

import jax
import jax.numpy as jnp
from jax import lax
from jax.experimental import pallas as pl
from jax.experimental.pallas import tpu as pltpu


def _round_up(x, m):
    return (x + m - 1) // m * m


def _stft_mag_kernel(frames_ref, basis_ref, out_ref, *, f_pad):
    # frames_ref: (1, n_fft, tm)     time-major frame tile (lane axis = frames)
    # basis_ref : (2*f_pad, n_fft)   fused window*[cos ; -sin] real-DFT basis
    # out_ref   : (1, f_pad, tm)     magnitude tile, (freq, frame) layout
    y = lax.dot_general(
        basis_ref[...], frames_ref[0],
        dimension_numbers=(((1,), (0,)), ((), ())),
        preferred_element_type=jnp.float32,
        precision=lax.Precision.HIGHEST)            # single MXU matmul per tile
    re = y[:f_pad, :]                               # sublane slices (cheap, 8-aligned)
    im = y[f_pad:, :]
    out_ref[0, :, :] = jnp.sqrt(re * re + im * im)


@functools.partial(jax.jit, static_argnames=("n_fft", "hop_length"))
def magnitude_stft(x, *, n_fft, hop_length):
    """x: (batch, time) float32 -> (batch, n_fft//2 + 1, n_frames) float32."""
    x = x.astype(jnp.float32)
    batch, _ = x.shape
    pad = n_fft // 2
    n_freq = n_fft // 2 + 1

    # --- framing glue (pure JAX): reflect pad + gather frames, time-major ----
    # TODO(synk): the materialized frames array is n_fft/hop_length x larger
    # than x in HBM; for small n_fft a manual-DMA kernel building frames from
    # the padded signal held in VMEM would cut HBM traffic by that factor.
    xp = jnp.pad(x, ((0, 0), (pad, pad)), mode="reflect")
    padded_len = xp.shape[1]
    n_frames = 1 + (padded_len - n_fft) // hop_length
    frame_idx = (jnp.arange(n_frames)[None, :] * hop_length
                 + jnp.arange(n_fft)[:, None])             # (n_fft, n_frames)
    frames = xp[:, frame_idx]                              # (batch, n_fft, n_frames)

    # --- tile the frame axis (lane axis inside the kernel) -------------------
    tm = 256
    # Keep the double-buffered frames tile within a modest VMEM budget for
    # large n_fft, but never below the 128-lane minimum.
    while tm > 128 and 2 * 4 * n_fft * tm > (8 << 20):
        tm //= 2
    tm = min(tm, _round_up(n_frames, 128))                 # lane-dense output tile
    n_frames_pad = _round_up(n_frames, tm)
    frames_p = jnp.pad(frames, ((0, 0), (0, 0), (0, n_frames_pad - n_frames)))

    # --- fused real-DFT basis with periodic Hann window folded in ------------
    f_pad = _round_up(n_freq, 8)
    k = jnp.arange(n_fft, dtype=jnp.int32)
    f = jnp.arange(f_pad, dtype=jnp.int32)
    km = (f[:, None] * k[None, :]) % n_fft                 # exact integer phase
    phase = (2.0 * jnp.pi / n_fft) * km.astype(jnp.float32)
    kf = jnp.arange(n_fft, dtype=jnp.float32)
    win = 0.5 * (1.0 - jnp.cos(2.0 * jnp.pi * kf / n_fft)) # periodic hann
    valid = (jnp.arange(f_pad) < n_freq).astype(jnp.float32)[:, None]
    cos_b = jnp.cos(phase) * win[None, :] * valid          # (f_pad, n_fft)
    sin_b = -jnp.sin(phase) * win[None, :] * valid
    basis = jnp.concatenate([cos_b, sin_b], axis=0)        # (2*f_pad, n_fft)
    # TODO(synk): for very large n_fft on v7x (64 MiB VMEM), cast basis/frames
    # to bf16 and/or add a K grid axis with an f32 VMEM accumulator.

    grid = (batch, n_frames_pad // tm)
    flops = 2 * batch * (2 * f_pad) * n_fft * n_frames_pad
    bytes_accessed = 4 * (frames_p.size + basis.size + batch * f_pad * n_frames_pad)

    out_p = pl.pallas_call(
        functools.partial(_stft_mag_kernel, f_pad=f_pad),
        out_shape=jax.ShapeDtypeStruct((batch, f_pad, n_frames_pad), jnp.float32),
        grid_spec=pltpu.PrefetchScalarGridSpec(
            num_scalar_prefetch=0,
            grid=grid,
            in_specs=[
                pl.BlockSpec((1, n_fft, tm), lambda b, i: (b, 0, i)),
                pl.BlockSpec((2 * f_pad, n_fft), lambda b, i: (0, 0)),
            ],
            out_specs=pl.BlockSpec((1, f_pad, tm), lambda b, i: (b, 0, i)),
        ),
        compiler_params=pltpu.CompilerParams(
            dimension_semantics=("parallel", "parallel"),
            vmem_limit_bytes=32 * 1024 * 1024),
        cost_estimate=pl.CostEstimate(
            flops=flops,
            transcendentals=batch * f_pad * n_frames_pad,
            bytes_accessed=bytes_accessed),
    )(frames_p, basis)

    return out_p[:, :n_freq, :n_frames]                    # (batch, n_freq, n_frames)


def _reference_stft_mag(x, n_fft, hop_length):
    """Pure-JAX reference mirroring torch.stft(...).abs() semantics."""
    pad = n_fft // 2
    xp = jnp.pad(x, ((0, 0), (pad, pad)), mode="reflect")
    n_frames = 1 + (xp.shape[1] - n_fft) // hop_length
    idx = jnp.arange(n_frames)[:, None] * hop_length + jnp.arange(n_fft)[None, :]
    frames = xp[:, idx]                                    # (B, T, n_fft)
    k = jnp.arange(n_fft, dtype=jnp.float32)
    win = 0.5 * (1.0 - jnp.cos(2.0 * jnp.pi * k / n_fft))
    spec = jnp.fft.rfft(frames * win[None, None, :], axis=-1)
    return jnp.abs(spec).transpose(0, 2, 1).astype(jnp.float32)


if __name__ == "__main__":
    n_fft = 64
    hop_length = 16
    batch, time = 2, 256

    key = jax.random.PRNGKey(0)
    x = jax.random.normal(key, (batch, time), dtype=jnp.float32)

    out = magnitude_stft(x, n_fft=n_fft, hop_length=hop_length)
    jax.block_until_ready(out)

    ref = _reference_stft_mag(x, n_fft, hop_length)
    assert out.shape == ref.shape, (out.shape, ref.shape)
    max_err = float(jnp.max(jnp.abs(out - ref)))
    tol = 1e-3 * max(1.0, float(jnp.max(jnp.abs(ref))))
    assert max_err < tol, (max_err, tol)

    print("KERNEL_OK")
</pallas_src>

<mosaic_0001>
module attributes {stable_mosaic.version = 11 : i64} {
  func.func @_stft_mag_kernel(%arg0: i32, %arg1: i32, %arg2: memref<1x64x128xf32, #tpu.memory_space<vmem>>, %arg3: memref<80x64xf32, #tpu.memory_space<vmem>>, %arg4: memref<1x40x128xf32, #tpu.memory_space<vmem>>) attributes {dimension_semantics = [#tpu.dimension_semantics<parallel>, #tpu.dimension_semantics<parallel>], iteration_bounds = array<i64: 2, 1>, scalar_prefetch = 0 : i64, scratch_operands = 0 : i64, tpu.core_type = #tpu.core_type<tc>, window_params = [{transform_indices = @transform_0, window_bounds = array<i64: 1, 64, 128>}, {pipeline_mode = #tpu.pipeline_mode<synchronous>, transform_indices = @transform_1, window_bounds = array<i64: 80, 64>}, {transform_indices = @transform_2, window_bounds = array<i64: 1, 40, 128>}]} {
    %c0 = arith.constant 0 : index
    %c0_0 = arith.constant 0 : index
    %0 = vector.load %arg3[%c0, %c0_0] : memref<80x64xf32, #tpu.memory_space<vmem>>, vector<80x64xf32>
    %c0_1 = arith.constant 0 : index
    %c0_2 = arith.constant 0 : index
    %c0_3 = arith.constant 0 : index
    %1 = vector.load %arg2[%c0_1, %c0_2, %c0_3] : memref<1x64x128xf32, #tpu.memory_space<vmem>>, vector<1x64x128xf32>
    %2 = vector.shape_cast %1 : vector<1x64x128xf32> to vector<64x128xf32>
    %cst = arith.constant dense<0.000000e+00> : vector<80x128xf32>
    %3 = tpu.matmul %0, %2, %cst {dimension_numbers = #tpu.dot_dimension_numbers<[1], [0], [0], [1], [0, 0, 1, 1], [], []>, precision = #tpu.contract_precision<fp32>} : vector<80x64xf32>, vector<64x128xf32>, vector<80x128xf32> -> vector<80x128xf32>
    %4 = vector.extract_strided_slice %3 {offsets = [0, 0], sizes = [40, 128], strides = [1, 1]} : vector<80x128xf32> to vector<40x128xf32>
    %5 = vector.extract_strided_slice %3 {offsets = [40, 0], sizes = [40, 128], strides = [1, 1]} : vector<80x128xf32> to vector<40x128xf32>
    %6 = arith.mulf %4, %4 : vector<40x128xf32>
    %7 = arith.mulf %5, %5 : vector<40x128xf32>
    %8 = arith.addf %6, %7 : vector<40x128xf32>
    %9 = math.sqrt %8 : vector<40x128xf32>
    %c0_4 = arith.constant 0 : index
    %c0_5 = arith.constant 0 : index
    %c0_6 = arith.constant 0 : index
    %10 = vector.load %arg4[%c0_4, %c0_5, %c0_6] : memref<1x40x128xf32, #tpu.memory_space<vmem>>, vector<1x40x128xf32>
    %11 = vector.shape_cast %10 : vector<1x40x128xf32> to vector<40x128xf32>
    %12 = vector.shape_cast %9 : vector<40x128xf32> to vector<1x40x128xf32>
    tpu.vector_store %arg4[%c0_4, %c0_5, %c0_6], %12 {strides = array<i32>} : memref<1x40x128xf32, #tpu.memory_space<vmem>>, vector<1x40x128xf32>,
    return
  }
  func.func @transform_0(%arg0: i32, %arg1: i32) -> (i32, i32, i32) {
    %c0_i32 = arith.constant 0 : i32
    %c0_i32_0 = arith.constant 0 : i32
    return %arg0, %c0_i32, %arg1 : i32, i32, i32
  }
  func.func @transform_1(%arg0: i32, %arg1: i32) -> (i32, i32) {
    %c0_i32 = arith.constant 0 : i32
    %c0_i32_0 = arith.constant 0 : i32
    %c0_i32_1 = arith.constant 0 : i32
    return %c0_i32, %c0_i32_0 : i32, i32
  }
  func.func @transform_2(%arg0: i32, %arg1: i32) -> (i32, i32, i32) {
    %c0_i32 = arith.constant 0 : i32
    %c0_i32_0 = arith.constant 0 : i32
    return %arg0, %c0_i32, %arg1 : i32, i32, i32
  }
}

</mosaic_0001>

<bundles_post_ra>
// kernel: magnitude_stft.1
= control target key start
LH: loop header
LB: loop body
LE: loop exit
PB: predicated region body
PF: predicated region fallthrough
CT: control target
= control target key end

     0   :  { %s1004_s9 = smov 0   ;;  %s1006_s10 = smov 0   ;;  %s1398_s0 = inlined_call_operand.vmem [shape: f32[2,64,128], index: 0, kind: input, shape index: {}]   ;;  %s1399_s1 = inlined_call_operand.vmem [shape: f32[80,64], index: 1, kind: input, shape index: {}]   ;;  %s1400_s2 = inlined_call_operand.vmem [shape: f32[2,40,128], index: 2, kind: output, shape index: {}]  }
   0x1   :  { %s1008_s11 = smov 0  }
   0x2 LB: > { %s24_s12 = sadd.s32 1, %s983_s10  ;;  %p907_p0 = scmp.ge.s32.totalorder %s987_s11, 1  ;;  %s987_s11 = sphi %s1008_s11, %s12_s11   ;;  %s983_s10 = sphi %s1006_s10, %s1402_s10   ;;  %s979_s9 = sphi %s1004_s9, %s1401_s9  }
   0x3   : > { %p26_p1 = scmp.ge.s32.totalorder %s24_s12, 2  ;;  %p131_p2 = scmp.lt.s32.totalorder %s987_s11, 3 }
   0x5   : > { %s1404_s12 = smov (%p26_p1, %s24_s12), 0  ;;  %p132_p3 = pnand %p907_p0, %p131_p2 }
   0x6   : > { %p159_p4 = scmp.lt.s32.totalorder (!%p132_p3), %s979_s9, 1 }
   0x7   : > { %135 = sbr.rel (%p132_p3) target bundleno = 317 (0x13d), region = 28 }
   0xc   : > { %v180_v0 = vld [vmem:[%s1399_s1 + $0x28] sm:$0xff]  ;;  %vm193_vm0 = vcmask 523264   ;;  %v175_v1 = vld [vmem:[%s1399_s1] sm:$0xff]  ;;  %s1406_s9 = smov (!%p159_p4, %s979_s9), 1  ;;  %v181_v3 = vld [vmem:[%s1399_s1 + $0x30] sm:$0xff] }
   0xd   : > { %v210_v2 = vsel %vm193_vm0, %v180_v0, 0  ;;  %v195_v4 = vsel %vm193_vm0, %v175_v1, 0  ;;  %s913_s19 = sshll.u32 %s1406_s9, 6  ;;  %v213_v9 = vsel %vm193_vm0, %v181_v3, 0  ;;  %v176_v35 = vld [vmem:[%s1399_s1 + $0x8] sm:$0xff]  ;;  %v182_v44 = vld [vmem:[%s1399_s1 + $0x38] sm:$0xff] }
   0xe   : > { %v1036_v5 = vand.u32 4294901760, %v210_v2  ;;  %s166_s22 = scalar_lea.vmem %s1398_s0, %s913_s19  ;;  %v1042_v10 = vand.u32 4294901760, %v195_v4  ;;  %v1080_v30 = vand.u32 4294901760, %v213_v9  ;;  %v198_v46 = vsel %vm193_vm0, %v176_v35, 0  ;;  %v177_v59 = vld [vmem:[%s1399_s1 + $0x10] sm:$0xff]  ;;  %s930_s13 = smul.u32 40, %s1406_s9 }
   0xf   : > { %v192_v6 = vld [vmem:[%s166_s22 + $0x38] sm:$0xff]  ;;  %v191_v7 = vld [vmem:[%s166_s22 + $0x30] sm:$0xff]  ;;  %v190_v8 = vld [vmem:[%s166_s22 + $0x28] sm:$0xff]  ;;  %v216_v54 = vsel %vm193_vm0, %v182_v44, 0  ;;  %v1140_v58 = vand.u32 4294901760, %v198_v46 }
  0x10   : > { %v1044_v11 = vand.u32 4294901760, %v192_v6  ;;  %v1046_v12 = vand.u32 4294901760, %v191_v7  ;;  %v1048_v13 = vand.u32 4294901760, %v190_v8  ;;  %v189_v14 = vld [vmem:[%s166_s22 + $0x20] sm:$0xff]  ;;  %v188_v15 = vld [vmem:[%s166_s22 + $0x18] sm:$0xff]  ;;  %v187_v16 = vld [vmem:[%s166_s22 + $0x10] sm:$0xff]  ;;  %v1057_v22 = vsub.f32 %v210_v2, %v1036_v5  ;;  %s1368_s15 = scalar_lea.vmem %s1400_s2, %s930_s13 }
  0x11   : > { %v1050_v17 = vand.u32 4294901760, %v189_v14  ;;  %v1052_v18 = vand.u32 4294901760, %v188_v15  ;;  %v1054_v19 = vand.u32 4294901760, %v187_v16  ;;  %v186_v20 = vld [vmem:[%s166_s22 + $0x8] sm:$0xff]  ;;  %v185_v21 = vld [vmem:[%s166_s22] sm:$0xff]  ;;  %v1099_v39 = vsub.f32 %v195_v4, %v1042_v10 }
  0x12   : > { %914 = vmatpush.msra.mxu2 %v1044_v11  ;;  %v1061_v23 = vsub.f32 %v192_v6, %v1044_v11  ;;  %v1064_v24 = vsub.f32 %v191_v7, %v1046_v12  ;;  %v1066_v25 = vand.u32 4294901760, %v186_v20  ;;  %v1069_v26 = vsub.f32 %v190_v8, %v1048_v13  ;;  %233 = vmatpush.msra.mxu0 %v1044_v11  ;;  %v183_v4 = vld [vmem:[%s1399_s1 + $0x40] sm:$0xff] }
  0x13   : > { %v1072_v27 = vand.u32 4294901760, %v185_v21  ;;  %v1075_v28 = vsub.f32 %v189_v14, %v1050_v17  ;;  %v1078_v29 = vsub.f32 %v188_v15, %v1052_v18  ;;  %v1088_v34 = vsub.f32 %v187_v16, %v1054_v19 }
  0x14   : > { %915 = vmatpush.msra.mxu2 %v1046_v12  ;;  %v339_v31 = vand.u32 4294901760, %v1061_v23  ;;  %v345_v32 = vand.u32 4294901760, %v1064_v24  ;;  %v351_v33 = vand.u32 4294901760, %v1069_v26  ;;  %235 = vmatpush.msra.mxu0 %v1046_v12  ;;  %v290_v37 = vand.u32 4294901760, %v1057_v22 }
  0x15   : > { %v357_v36 = vand.u32 4294901760, %v1075_v28  ;;  %v1096_v38 = vsub.f32 %v186_v20, %v1066_v25  ;;  %v363_v43 = vand.u32 4294901760, %v1078_v29  ;;  %v1117_v45 = vsub.f32 %v185_v21, %v1072_v27 }
  0x16   : > { %916 = vmatpush.msra.mxu2 %v1048_v13  ;;  %v340_v40 = vsub.f32 %v1061_v23, %v339_v31  ;;  %v346_v41 = vsub.f32 %v1064_v24, %v345_v32  ;;  %v352_v42 = vsub.f32 %v1069_v26, %v351_v33  ;;  %237 = vmatpush.msra.mxu0 %v1048_v13  ;;  %v369_v50 = vand.u32 4294901760, %v1088_v34 }
  0x17   : > { %v358_v49 = vsub.f32 %v1075_v28, %v357_v36  ;;  %v291_v51 = vsub.f32 %v1057_v22, %v290_v37  ;;  %v1130_v52 = vsub.f32 %v213_v9, %v1080_v30  ;;  %v250_v53 = vand.u32 4294901760, %v1099_v39 }
  0x18   : > { %917 = vmatpush.msra.mxu2 %v1050_v17  ;;  %v341_v47 = vand.u32 4294901760, %v340_v40  ;;  %v347_v48 = vand.u32 4294901760, %v346_v41  ;;  %239 = vmatpush.msra.mxu0 %v1050_v17  ;;  %v353_v55 = vand.u32 4294901760, %v352_v42  ;;  %v364_v56 = vsub.f32 %v1078_v29, %v363_v43  ;;  %v178_v42 = vld [vmem:[%s1399_s1 + $0x18] sm:$0xff] }
  0x19   : > { %v375_v57 = vand.u32 4294901760, %v1096_v38  ;;  %v359_v60 = vand.u32 4294901760, %v358_v49  ;;  %v370_v61 = vsub.f32 %v1088_v34, %v369_v50  ;;  %v381_v62 = vand.u32 4294901760, %v1117_v45 }
  0x1a   : > { %918 = vmatpush.msra.mxu2 %v1052_v18  ;;  %922 = vmatpush.msra.mxu3 %v341_v47  ;;  %v1150_v63 = vand.u32 4294901760, %v216_v54  ;;  %v292_v0 = vand.u32 4294901760, %v291_v51  ;;  %v298_v1 = vand.u32 4294901760, %v1130_v52  ;;  %v251_v2 = vsub.f32 %v1099_v39, %v250_v53 }
  0x1b   : > { %342 = vmatpush.msra.mxu1 %v341_v47  ;;  %241 = vmatpush.msra.mxu0 %v1052_v18  ;;  %v1158_v3 = vsub.f32 %v198_v46, %v1140_v58  ;;  %v365_v6 = vand.u32 4294901760, %v364_v56  ;;  %v376_v7 = vsub.f32 %v1096_v38, %v375_v57  ;;  %v201_v8 = vsel %vm193_vm0, %v177_v59, 0 }
  0x1c   : > { %919 = vmatpush.msra.mxu2 %v1054_v19  ;;  %923 = vmatpush.msra.mxu3 %v347_v48  ;;  %v371_v9 = vand.u32 4294901760, %v370_v61  ;;  %v382_v14 = vsub.f32 %v1117_v45, %v381_v62  ;;  %v1174_v15 = vsub.f32 %v216_v54, %v1150_v63  ;;  %v219_v16 = vsel %vm193_vm0, %v183_v4, 0  ;;  %v184_v54 = vld [vmem:[%s1399_s1 + $0x48] sm:$0xff] }
  0x1d   : > { %348 = vmatpush.msra.mxu1 %v347_v48  ;;  %243 = vmatpush.msra.mxu0 %v1054_v19  ;;  %v299_v20 = vsub.f32 %v1130_v52, %v298_v1  ;;  %v252_v21 = vand.u32 4294901760, %v251_v2  ;;  %v258_v35 = vand.u32 4294901760, %v1158_v3  ;;  %v1181_v40 = vand.u32 4294901760, %v201_v8 }
  0x1e   : > { %920 = vmatpush.msra.mxu2 %v1066_v25  ;;  %924 = vmatpush.msra.mxu3 %v353_v55  ;;  %v377_v41 = vand.u32 4294901760, %v376_v7  ;;  %v383_v44 = vand.u32 4294901760, %v382_v14  ;;  %v306_v46 = vand.u32 4294901760, %v1174_v15  ;;  %v1190_v47 = vand.u32 4294901760, %v219_v16 }
  0x1f   : > { %354 = vmatpush.msra.mxu1 %v353_v55  ;;  %245 = vmatpush.msra.mxu0 %v1066_v25  ;;  %v300_v48 = vand.u32 4294901760, %v299_v20  ;;  %v259_v49 = vsub.f32 %v1158_v3, %v258_v35  ;;  %v1196_v51 = vsub.f32 %v201_v8, %v1181_v40  ;;  %v204_v55 = vsel %vm193_vm0, %v178_v42, 0 }
  0x20   : > { %921 = vmatpush.msra.mxu2 %v1072_v27  ;;  %925 = vmatpush.msra.mxu3 %v359_v60  ;;  %v307_v56 = vsub.f32 %v1174_v15, %v306_v46  ;;  %v1210_v59 = vsub.f32 %v219_v16, %v1190_v47 }
  0x21   : > { %293 = vmatmul.f32.vlgmr.msra.gmra.mxu2 %v292_v0  ;;  %360 = vmatpush.msra.mxu1 %v359_v60  ;;  %v260_v60 = vand.u32 4294901760, %v259_v49  ;;  %v266_v61 = vand.u32 4294901760, %v1196_v51  ;;  %v222_v0 = vsel %vm193_vm0, %v184_v54, 0 }
  0x22   : > { %926 = vmatpush.msra.mxu3 %v365_v6  ;;  %436 = vmatpush.msrb.mxu2 %v1061_v23  ;;  %v1215_v23 = vand.u32 4294901760, %v204_v55  ;;  %v1226_v2 = vand.u32 4294901760, %v222_v0  ;;  %v308_v4 = vand.u32 4294901760, %v307_v56 }
  0x23   : > { %366 = vmatpush.msra.mxu1 %v365_v6  ;;  %247 = vmatpush.msra.mxu0 %v1072_v27  ;;  %v314_v6 = vand.u32 4294901760, %v1210_v59 }
  0x24   : > { %927 = vmatpush.msra.mxu3 %v371_v9  ;;  %439 = vmatpush.msrb.mxu2 %v1064_v24  ;;  %v267_v24 = vsub.f32 %v1196_v51, %v266_v61  ;;  %v1245_v7 = vsub.f32 %v222_v0, %v1226_v2 }
  0x25   : > { %372 = vmatpush.msra.mxu1 %v371_v9  ;;  %253 = vmatmul.f32.vlgmr.msra.gmra.mxu0 %v252_v21 }
  0x26   : > { %928 = vmatpush.msra.mxu3 %v377_v41  ;;  %442 = vmatpush.msrb.mxu2 %v1069_v26  ;;  %v268_v8 = vand.u32 4294901760, %v267_v24  ;;  %v322_v9 = vand.u32 4294901760, %v1245_v7 }
  0x27   : > { %378 = vmatpush.msra.mxu1 %v377_v41  ;;  %605 = vmatpush.msrb.mxu0 %v339_v31  ;;  %v179_v31 = vld [vmem:[%s1399_s1 + $0x20] sm:$0xff] }
  0x28   : > { %929 = vmatpush.msra.mxu3 %v383_v44  ;;  %445 = vmatpush.msrb.mxu2 %v1075_v28 }
  0x29   : > { %301 = vmatmul.f32.gmra.mxu2 %v300_v48  ;;  %406 = vmatmul.f32.vlgmr.msra.gmra.mxu3 %v1036_v5 }
  0x2a   : > { %518 = vmatpush.msrb.mxu3 %v1044_v11  ;;  %384 = vmatpush.msra.mxu1 %v383_v44 }
  0x2b   : > { %386 = vmatmul.f32.vlgmr.msra.gmra.mxu1 %v1042_v10  ;;  %609 = vmatpush.msrb.mxu0 %v345_v32  ;;  %v1234_v32 = vsub.f32 %v204_v55, %v1215_v23 }
  0x2c   : > { %520 = vmatpush.msrb.mxu3 %v1046_v12  ;;  %684 = vmatpush.msrb.mxu1 %v1044_v11  ;;  %v207_v11 = vsel %vm193_vm0, %v179_v31, 0 }
  0x2d   : > { %261 = vmatmul.f32.gmra.mxu0 %v260_v60  ;;  %448 = vmatpush.msrb.mxu2 %v1078_v29  ;;  %v274_v26 = vand.u32 4294901760, %v1234_v32 }
  0x2e   : > { %522 = vmatpush.msrb.mxu3 %v1048_v13  ;;  %686 = vmatpush.msrb.mxu1 %v1046_v12  ;;  %v315_v12 = vsub.f32 %v1210_v59, %v314_v6 }
  0x2f   : > { %613 = vmatpush.msrb.mxu0 %v351_v33  ;;  %451 = vmatpush.msrb.mxu2 %v1088_v34  ;;  %v280_v33 = vand.u32 4294901760, %v207_v11  ;;  %v275_v14 = vsub.f32 %v1234_v32, %v274_v26 }
  0x30   : > { %524 = vmatpush.msrb.mxu3 %v1050_v17  ;;  %688 = vmatpush.msrb.mxu1 %v1048_v13  ;;  %v316_v13 = vand.u32 4294901760, %v315_v12 }
  0x31   : > { %309 = vmatmul.f32.gmra.mxu2 %v308_v4  ;;  %410 = vmatmul.f32.gmra.mxu3 %v1080_v30  ;;  %v281_v16 = vsub.f32 %v207_v11, %v280_v33  ;;  %v276_v28 = vand.u32 4294901760, %v275_v14 }
  0x32   : > { %526 = vmatpush.msrb.mxu3 %v1052_v18  ;;  %617 = vmatpush.msrb.mxu0 %v357_v36 }
  0x33   : > { %390 = vmatmul.f32.gmra.mxu1 %v1140_v58  ;;  %454 = vmatpush.msrb.mxu2 %v1096_v38  ;;  %v282_v36 = vand.u32 4294901760, %v281_v16 }
  0x34   : > { %528 = vmatpush.msrb.mxu3 %v1054_v19  ;;  %690 = vmatpush.msrb.mxu1 %v1050_v17  ;;  %v323_v17 = vsub.f32 %v1245_v7, %v322_v9 }
  0x35   : > { %269 = vmatmul.f32.gmra.mxu0 %v268_v8  ;;  %457 = vmatpush.msrb.mxu2 %v1117_v45  ;;  %v283_v29 = vsub.f32 %v281_v16, %v282_v36 }
  0x36   : > { %621 = vmatpush.msrb.mxu0 %v363_v43  ;;  %530 = vmatpush.msrb.mxu3 %v1066_v25 }
  0x37   : > { %692 = vmatpush.msrb.mxu1 %v1052_v18  ;;  %v324_v18 = vand.u32 4294901760, %v323_v17  ;;  %v284_v34 = vand.u32 4294901760, %v283_v29 }
  0x38   : > { %625 = vmatpush.msrb.mxu0 %v369_v50  ;;  %532 = vmatpush.msrb.mxu3 %v1072_v27 }
  0x39   : > { %317 = vmatmul.f32.gmra.mxu2 %v316_v13  ;;  %414 = vmatmul.f32.gmra.mxu3 %v1150_v63 }
  0x3a   : > { %694 = vmatpush.msrb.mxu1 %v1054_v19  ;;  %629 = vmatpush.msrb.mxu0 %v375_v57 }
  0x3b   : > { %394 = vmatmul.f32.gmra.mxu1 %v1181_v40 }
  0x3c   : > { %696 = vmatpush.msrb.mxu1 %v1066_v25  ;;  %633 = vmatpush.msrb.mxu0 %v381_v62 }
  0x3d   : > { %277 = vmatmul.f32.gmra.mxu0 %v276_v28 }
  0x3e   : > { %698 = vmatpush.msrb.mxu1 %v1072_v27 }
  0x41   : > { %325 = vmatmul.f32.gmra.mxu2 %v324_v18  ;;  %418 = vmatmul.f32.gmra.mxu3 %v1190_v47 }
  0x43   : > { %398 = vmatmul.f32.gmra.mxu1 %v1215_v23 }
  0x45   : > { %285 = vmatmul.f32.gmra.mxu0 %v284_v34 }
  0x49   : > { %422 = vmatmul.f32.gmra.mxu3 %v1226_v2  ;;  %460 = vmatmul.f32.vlgmr.msrb.gmra.mxu2 %v1099_v39 }
  0x4b   : > { %402 = vmatmul.f32.gmra.mxu1 %v280_v33 }
  0x4d   : > { %635 = vmatmul.f32.vlgmr.msrb.gmra.mxu0 %v1042_v10 }
  0x51   : > { %465 = vmatmul.f32.gmra.mxu2 %v1158_v3  ;;  %536 = vmatmul.f32.vlgmr.msrb.gmra.mxu3 %v250_v53 }
  0x53   : > { %700 = vmatmul.f32.vlgmr.msrb.gmra.mxu1 %v1042_v10 }
  0x55   : > { %639 = vmatmul.f32.gmra.mxu0 %v1140_v58 }
  0x59   : > { %470 = vmatmul.f32.gmra.mxu2 %v1196_v51  ;;  %542 = vmatmul.f32.gmra.mxu3 %v258_v35 }
  0x5b   : > { %704 = vmatmul.f32.gmra.mxu1 %v1140_v58 }
  0x5d   : > { %643 = vmatmul.f32.gmra.mxu0 %v1181_v40 }
  0x61   : > { %475 = vmatmul.f32.gmra.mxu2 %v1234_v32  ;;  %548 = vmatmul.f32.gmra.mxu3 %v266_v61 }
  0x63   : > { %708 = vmatmul.f32.gmra.mxu1 %v1181_v40 }
  0x65   : > { %647 = vmatmul.f32.gmra.mxu0 %v1215_v23 }
  0x69   : > { %480 = vmatmul.f32.gmra.mxu2 %v281_v16  ;;  %554 = vmatmul.f32.gmra.mxu3 %v274_v26 }
  0x6b   : > { %712 = vmatmul.f32.gmra.mxu1 %v1215_v23 }
  0x6d   : > { %651 = vmatmul.f32.gmra.mxu0 %v280_v33 }
  0x71   : > { %485 = vmatmul.f32.gmra.mxu2 %v1057_v22  ;;  %560 = vmatmul.f32.gmra.mxu3 %v282_v36 }
  0x73   : > { %716 = vmatmul.f32.gmra.mxu1 %v280_v33 }
  0x75   : > { %655 = vmatmul.f32.gmra.mxu0 %v1036_v5 }
  0x79   : > { %490 = vmatmul.f32.gmra.mxu2 %v1130_v52  ;;  %566 = vmatmul.f32.gmra.mxu3 %v290_v37 }
  0x7b   : > { %720 = vmatmul.f32.gmra.mxu1 %v1036_v5 }
  0x7d   : > { %659 = vmatmul.f32.gmra.mxu0 %v1080_v30 }
  0x81   : > { %495 = vmatmul.f32.gmra.mxu2 %v1174_v15  ;;  %572 = vmatmul.f32.gmra.mxu3 %v298_v1 }
  0x83   : > { %724 = vmatmul.f32.gmra.mxu1 %v1080_v30 }
  0x85   : > { %663 = vmatmul.f32.gmra.mxu0 %v1150_v63 }
  0x89   : > { %500 = vmatmul.f32.gmra.mxu2 %v1210_v59  ;;  %578 = vmatmul.f32.gmra.mxu3 %v306_v46 }
  0x8b   : > { %728 = vmatmul.f32.gmra.mxu1 %v1150_v63 }
  0x8d   : > { %667 = vmatmul.f32.gmra.mxu0 %v1190_v47 }
  0x91   : > { %505 = vmatmul.f32.gmra.mxu2 %v1245_v7  ;;  %584 = vmatmul.f32.gmra.mxu3 %v314_v6 }
  0x93   : > { %732 = vmatmul.f32.gmra.mxu1 %v1190_v47 }
  0x95   : > { %671 = vmatmul.f32.gmra.mxu0 %v1226_v2 }
  0x99   : > { %590 = vmatmul.f32.gmra.mxu3 %v322_v9 }
  0x9b   : > { %736 = vmatmul.f32.gmra.mxu1 %v1226_v2 }
  0xa2   : > { %v254_v5 = vpop.f32.mrf.mxu0 }
  0xa4   : > { %v294_v10 = vpop.f32.mrf.mxu2 }
  0xa8   : > { %v387_v19 = vpop.f32.mrf.mxu1 }
  0xa9   : > { %v388_v22 = vadd.f32 %v387_v19, %v254_v5 }
  0xaa   : > { %v262_v25 = vpop.f32.mrf.mxu0 }
  0xac   : > { %v302_v27 = vpop.f32.mrf.mxu2  ;;  %v407_v30 = vpop.f32.mrf.mxu3 }
  0xad   : > { %v408_v37 = vadd.f32 %v407_v30, %v294_v10 }
  0xb0   : > { %v391_v38 = vpop.f32.mrf.mxu1 }
  0xb1   : > { %v392_v39 = vadd.f32 %v391_v38, %v262_v25 }
  0xb2   : > { %v270_v43 = vpop.f32.mrf.mxu0 }
  0xb4   : > { %v310_v45 = vpop.f32.mrf.mxu2  ;;  %v411_v50 = vpop.f32.mrf.mxu3 }
  0xb5   : > { %v412_v52 = vadd.f32 %v411_v50, %v302_v27 }
  0xb8   : > { %v395_v53 = vpop.f32.mrf.mxu1 }
  0xb9   : > { %v396_v57 = vadd.f32 %v395_v53, %v270_v43 }
  0xba   : > { %v278_v58 = vpop.f32.mrf.mxu0 }
  0xbc   : > { %v318_v62 = vpop.f32.mrf.mxu2  ;;  %v415_v63 = vpop.f32.mrf.mxu3 }
  0xbd   : > { %v1327_v1 = vadd.f32 %v415_v63, %v310_v45 }
  0xc0   : > { %v399_v3 = vpop.f32.mrf.mxu1 }
  0xc1   : > { %v1329_v15 = vadd.f32 %v399_v3, %v278_v58 }
  0xc2   : > { %v286_v20 = vpop.f32.mrf.mxu0 }
  0xc4   : > { %v326_v21 = vpop.f32.mrf.mxu2  ;;  %v419_v35 = vpop.f32.mrf.mxu3 }
  0xc5   : > { %v1331_v40 = vadd.f32 %v419_v35, %v318_v62 }
  0xc8   : > { %v403_v41 = vpop.f32.mrf.mxu1 }
  0xc9   : > { %v1333_v42 = vadd.f32 %v403_v41, %v286_v20 }
  0xca   : > { %v636_v44 = vpop.f32.mrf.mxu0 }
  0xcc   : > { %v423_v46 = vpop.f32.mrf.mxu3  ;;  %v461_v47 = vpop.f32.mrf.mxu2 }
  0xcd   : > { %v1335_v48 = vadd.f32 %v423_v46, %v326_v21  ;;  %v462_v26 = vadd.f32 %v461_v47, %v388_v22 }
  0xd0   : > { %v701_v49 = vpop.f32.mrf.mxu1 }
  0xd2   : > { %v640_v51 = vpop.f32.mrf.mxu0 }
  0xd4   : > { %v466_v54 = vpop.f32.mrf.mxu2  ;;  %v537_v55 = vpop.f32.mrf.mxu3 }
  0xd5   : > { %v538_v33 = vadd.f32 %v537_v55, %v462_v26  ;;  %v467_v36 = vadd.f32 %v466_v54, %v392_v39 }
  0xd7   : > { %v637_v9 = vadd.f32 %v636_v44, %v538_v33 }
  0xd8   : > { %v705_v56 = vpop.f32.mrf.mxu1 }
  0xd9   : > { %v702_v29 = vadd.f32 %v701_v49, %v637_v9 }
  0xda   : > { %v644_v59 = vpop.f32.mrf.mxu0 }
  0xdb   : > { %v740_v25 = vmul.f32 %v702_v29, %v702_v29 }
  0xdc   : > { %v471_v60 = vpop.f32.mrf.mxu2  ;;  %v543_v61 = vpop.f32.mrf.mxu3 }
  0xdd   : > { %v544_v5 = vadd.f32 %v543_v61, %v467_v36  ;;  %v472_v45 = vadd.f32 %v471_v60, %v396_v57 }
  0xdf   : > { %v641_v38 = vadd.f32 %v640_v51, %v544_v5 }
  0xe0   : > { %v709_v0 = vpop.f32.mrf.mxu1 }
  0xe1   : > { %v706_v58 = vadd.f32 %v705_v56, %v641_v38 }
  0xe2   : > { %v1337_v23 = vpop.f32.mrf.mxu0 }
  0xe3   : > { %v741_v35 = vmul.f32 %v706_v58, %v706_v58 }
  0xe4   : > { %v476_v31 = vpop.f32.mrf.mxu2  ;;  %v549_v2 = vpop.f32.mrf.mxu3 }
  0xe5   : > { %v477_v47 = vadd.f32 %v476_v31, %v1329_v15 }
  0xe8   : > { %v1339_v4 = vpop.f32.mrf.mxu1 }
  0xea   : > { %v1341_v6 = vpop.f32.mrf.mxu0 }
  0xec   : > { %v1343_v24 = vpop.f32.mrf.mxu2  ;;  %v555_v32 = vpop.f32.mrf.mxu3 }
  0xed   : > { %v556_v56 = vadd.f32 %v555_v32, %v477_v47 }
  0xef   : > { %v649_v15 = vadd.f32 %v1337_v23, %v556_v56 }
  0xf0   : > { %v1345_v11 = vpop.f32.mrf.mxu1 }
  0xf2   : > { %v656_v7 = vpop.f32.mrf.mxu0 }
  0xf4   : > { %v486_v12 = vpop.f32.mrf.mxu2  ;;  %v1347_v8 = vpop.f32.mrf.mxu3 }
  0xf5   : > { %v487_v14 = vadd.f32 %v486_v12, %v408_v37  ;;  %v550_v37 = vadd.f32 %v549_v2, %v472_v45 }
  0xf7   : > { %v645_v20 = vadd.f32 %v644_v59, %v550_v37 }
  0xf8   : > { %v721_v13 = vpop.f32.mrf.mxu1 }
  0xf9   : > { %v710_v54 = vadd.f32 %v709_v0, %v645_v20  ;;  %v482_v0 = vadd.f32 %v1343_v24, %v1333_v42 }
  0xfa   : > { %v660_v18 = vpop.f32.mrf.mxu0 }
  0xfb   : > { %v742_v2 = vmul.f32 %v710_v54, %v710_v54 }
  0xfc   : > { %v491_v16 = vpop.f32.mrf.mxu2  ;;  %v567_v17 = vpop.f32.mrf.mxu3 }
  0xfd   : > { %v568_v28 = vadd.f32 %v567_v17, %v487_v14  ;;  %v492_v27 = vadd.f32 %v491_v16, %v412_v52  ;;  %v562_v16 = vadd.f32 %v1347_v8, %v482_v0 }
  0xff   : > { %v657_v34 = vadd.f32 %v656_v7, %v568_v28  ;;  %v653_v29 = vadd.f32 %v1341_v6, %v562_v16 }
 0x100   : > { %v725_v10 = vpop.f32.mrf.mxu1 }
 0x101   : > { %v722_v19 = vadd.f32 %v721_v13, %v657_v34 }
 0x102   : > { %v664_v39 = vpop.f32.mrf.mxu0 }
 0x103   : > { %v745_v30 = vmul.f32 %v722_v19, %v722_v19 }
 0x104   : > { %v496_v43 = vpop.f32.mrf.mxu2  ;;  %v573_v22 = vpop.f32.mrf.mxu3 }
 0x105   : > { %v750_v50 = vadd.f32 %v745_v30, %v740_v25  ;;  %v574_v53 = vadd.f32 %v573_v22, %v492_v27  ;;  %v497_v21 = vadd.f32 %v496_v43, %v1327_v1 }
 0x107   : > { %955 = vrsqrt.f32 %v750_v50  ;;  %v661_v62 = vadd.f32 %v660_v18, %v574_v53  ;;  %vm762_vm1 = vcmp.eq.f32.partialorder %v750_v50, inf  ;;  %v765_v42 = vand.u32 2147483648, %v750_v50 }
 0x108   : > { %v729_v3 = vpop.f32.mrf.mxu1  ;;  %vm764_vm2 = vcmp.eq.f32.partialorder %v750_v50, 0.0 }
 0x109   : > { %v726_v63 = vadd.f32 %v725_v10, %v661_v62 }
 0x10a   : > { %v668_v61 = vpop.f32.mrf.mxu0 }
 0x10b   : > { %v746_v41 = vmul.f32 %v726_v63, %v726_v63 }
 0x10c   : > { %v579_v52 = vpop.f32.mrf.mxu3  ;;  %v501_v51 = vpop.f32.mrf.mxu2 }
 0x10d   : > { %v956_v44 = vpop.eup %955  ;;  %v580_v46 = vadd.f32 %v579_v52, %v497_v21  ;;  %v1351_v49 = vadd.f32 %v746_v41, %v741_v35  ;;  %v502_v7 = vadd.f32 %v501_v51, %v1331_v40  ;;  %v714_v40 = vadd.f32 %v1339_v4, %v649_v15 }
 0x10e   : > { %v756_v57 = vmul.f32 %v956_v44, %v750_v50 }
 0x10f   : > { %v665_v55 = vadd.f32 %v664_v39, %v580_v46  ;;  %957 = vrsqrt.f32 %v1351_v49  ;;  %v743_v10 = vmul.f32 %v714_v40, %v714_v40  ;;  %vm774_vm3 = vcmp.eq.f32.partialorder %v1351_v49, inf }
 0x110   : > { %v757_v60 = vmul.f32 %v956_v44, %v756_v57  ;;  %v733_v33 = vpop.f32.mrf.mxu1  ;;  %v777_v39 = vand.u32 2147483648, %v1351_v49  ;;  %vm776_vm4 = vcmp.eq.f32.partialorder %v1351_v49, 0.0 }
 0x111   : > { %v730_v59 = vadd.f32 %v729_v3, %v665_v55 }
 0x112   : > { %v758_v1 = vmul.f32 0.5, %v757_v60  ;;  %v672_v27 = vpop.f32.mrf.mxu0 }
 0x113   : > { %v747_v12 = vmul.f32 %v730_v59, %v730_v59 }
 0x114   : > { %v759_v31 = vsub.f32 1.5, %v758_v1  ;;  %v585_v26 = vpop.f32.mrf.mxu3  ;;  %v506_v28 = vpop.f32.mrf.mxu2 }
 0x115   : > { %v1359_v32 = vadd.f32 %v747_v12, %v742_v2  ;;  %v586_v13 = vadd.f32 %v585_v26, %v502_v7  ;;  %v958_v9 = vpop.eup %957  ;;  %v507_v4 = vadd.f32 %v506_v28, %v1335_v48 }
 0x116   : > { %v760_v14 = vmul.f32 %v956_v44, %v759_v31  ;;  %v768_v17 = vmul.f32 %v958_v9, %v1351_v49 }
 0x117   : > { %959 = vrsqrt.f32 %v1359_v32  ;;  %v669_v36 = vadd.f32 %v668_v61, %v586_v13  ;;  %vm786_vm5 = vcmp.eq.f32.partialorder %v1359_v32, inf  ;;  %v789_v57 = vand.u32 2147483648, %v1359_v32 }
 0x118   : > { %v761_v23 = vmul.f32 %v760_v14, %v750_v50  ;;  %v769_v24 = vmul.f32 %v958_v9, %v768_v17  ;;  %v737_v53 = vpop.f32.mrf.mxu1  ;;  %vm788_vm6 = vcmp.eq.f32.partialorder %v1359_v32, 0.0 }
 0x119   : > { %v734_v8 = vadd.f32 %v733_v33, %v669_v36 }
 0x11a   : > { %v763_v18 = vsel %vm762_vm1, %v750_v50, %v761_v23  ;;  %v770_v5 = vmul.f32 0.5, %v769_v24  ;;  %v718_v50 = vadd.f32 %v1345_v11, %v653_v29 }
 0x11b   : > { %v766_v34 = vsel %vm764_vm2, %v765_v42, %v763_v18  ;;  %v748_v19 = vmul.f32 %v734_v8, %v734_v8 }
 0x11c   : > { %815 = vst [vmem:[%s1368_s15] sm:$0xff] %v766_v34  ;;  %v591_v25 = vpop.f32.mrf.mxu3  ;;  %v771_v38 = vsub.f32 1.5, %v770_v5  ;;  %v744_v3 = vmul.f32 %v718_v50, %v718_v50 }
 0x11d   : > { %v960_v30 = vpop.eup %959  ;;  %v592_v43 = vadd.f32 %v591_v25, %v507_v4  ;;  %v753_v45 = vadd.f32 %v748_v19, %v743_v10 }
 0x11e   : > { %v780_v22 = vmul.f32 %v960_v30, %v1359_v32  ;;  %v772_v6 = vmul.f32 %v958_v9, %v771_v38 }
 0x11f   : > { %v673_v37 = vadd.f32 %v672_v27, %v592_v43  ;;  %961 = vrsqrt.f32 %v753_v45  ;;  %vm798_vm7 = vcmp.eq.f32.partialorder %v753_v45, inf  ;;  %v801_v7 = vand.u32 2147483648, %v753_v45 }
 0x120   : > { %v781_v58 = vmul.f32 %v960_v30, %v780_v22  ;;  %v773_v48 = vmul.f32 %v772_v6, %v1351_v49  ;;  %vm800_vm8 = vcmp.eq.f32.partialorder %v753_v45, 0.0 }
 0x121   : > { %v738_v62 = vadd.f32 %v737_v53, %v673_v37 }
 0x122   : > { %v782_v63 = vmul.f32 0.5, %v781_v58  ;;  %v775_v20 = vsel %vm774_vm3, %v1351_v49, %v773_v48 }
 0x123   : > { %v749_v21 = vmul.f32 %v738_v62, %v738_v62  ;;  %v778_v11 = vsel %vm776_vm4, %v777_v39, %v775_v20 }
 0x124   : > { %v783_v35 = vsub.f32 1.5, %v782_v63  ;;  %816 = vst [vmem:[%s1368_s15 + $0x8] sm:$0xff] %v778_v11 }
 0x125   : > { %v754_v41 = vadd.f32 %v749_v21, %v744_v3  ;;  %v962_v52 = vpop.eup %961 }
 0x126   : > { %v784_v44 = vmul.f32 %v960_v30, %v783_v35  ;;  %v792_v46 = vmul.f32 %v962_v52, %v753_v45 }
 0x127   : > { %963 = vrsqrt.f32 %v754_v41  ;;  %vm810_vm9 = vcmp.eq.f32.partialorder %v754_v41, inf  ;;  %vm812_vm10 = vcmp.eq.f32.partialorder %v754_v41, 0.0 }
 0x128   : > { %v785_v47 = vmul.f32 %v784_v44, %v1359_v32  ;;  %v793_v51 = vmul.f32 %v962_v52, %v792_v46 }
 0x12a   : > { %v787_v54 = vsel %vm786_vm5, %v1359_v32, %v785_v47  ;;  %v794_v55 = vmul.f32 0.5, %v793_v51  ;;  %v813_v32 = vand.u32 2147483648, %v754_v41 }
 0x12b   : > { %v790_v49 = vsel %vm788_vm6, %v789_v57, %v787_v54 }
 0x12c   : > { %817 = vst [vmem:[%s1368_s15 + $0x10] sm:$0xff] %v790_v49  ;;  %v795_v60 = vsub.f32 1.5, %v794_v55 }
 0x12d   : > { %v964_v56 = vpop.eup %963 }
 0x12e   : > { %v804_v59 = vmul.f32 %v964_v56, %v754_v41  ;;  %v796_v1 = vmul.f32 %v962_v52, %v795_v60 }
 0x130   : > { %v805_v61 = vmul.f32 %v964_v56, %v804_v59  ;;  %v797_v2 = vmul.f32 %v796_v1, %v753_v45 }
 0x132   : > { %v806_v12 = vmul.f32 0.5, %v805_v61  ;;  %v799_v15 = vsel %vm798_vm7, %v753_v45, %v797_v2 }
 0x133   : > { %v802_v31 = vsel %vm800_vm8, %v801_v7, %v799_v15 }
 0x134   : > { %v807_v26 = vsub.f32 1.5, %v806_v12  ;;  %818 = vst [vmem:[%s1368_s15 + $0x18] sm:$0xff] %v802_v31 }
 0x136   : > { %v808_v33 = vmul.f32 %v964_v56, %v807_v26 }
 0x138   : > { %v809_v0 = vmul.f32 %v808_v33, %v754_v41 }
 0x13a   : > { %v811_v13 = vsel %vm810_vm9, %v754_v41, %v809_v0 }
 0x13b   : > { %v814_v9 = vsel %vm812_vm10, %v813_v32, %v811_v13 }
 0x13c   : > { %819 = vst [vmem:[%s1368_s15 + $0x20] sm:$0xff] %v814_v9 }
 0x13d PF: > { %s12_s11 = sadd.s32 1, %s987_s11   ;;  %s1401_s9 = smov %s983_s10 }
 0x13e   : > { %p9_p5 = scmp.ge.s32.totalorder %s12_s11, 4   ;;  %s1402_s10 = smov %s1404_s12 }
 0x140   :  { %11 = sbr.rel (!%p9_p5) target bundleno = 2 (0x2), region = 58 }

</bundles_post_ra>
